<compile_context>
chip_gen: v7x
topology: tpu7x:2x2x1
jax: 0.10.0
libtpu: 0.0.40
codegen_flags: <defaults>
</compile_context>

<pallas_src>
import functools

import jax
import jax.numpy as jnp
from jax import lax
from jax.experimental import pallas as pl
from jax.experimental.pallas import tpu as pltpu

_VMEM_LIMIT = 32 * 1024 * 1024  # safe on v5e/v6e (128 MiB) and v7x (64 MiB)


def _pick_tile(dim, desired, unit):
    """Largest tile <= desired that divides dim (dim itself if dim <= desired)."""
    if dim <= desired:
        return dim
    t = desired
    while t > unit and dim % t != 0:
        t //= 2
    if dim % t != 0:
        raise ValueError(f"dimension {dim} cannot be tiled down to unit {unit}")
    return t


# ----------------------------------------------------------------------------
# Kernel 1: fp32 reference matmul  out = x @ w.T   (runs once in __init__)
# ----------------------------------------------------------------------------
def _matmul_kernel(x_ref, w_ref, o_ref):
    @pl.when(pl.program_id(2) == 0)
    def _():
        o_ref[...] = jnp.zeros_like(o_ref)

    # Contract the last dim of both operands -> no in-kernel transpose.
    o_ref[...] += lax.dot_general(
        x_ref[...], w_ref[...],
        dimension_numbers=(((1,), (1,)), ((), ())),
        preferred_element_type=jnp.float32)


def matmul_xwt(x, w):
    """x: (M, K) f32, w: (N, K) f32  ->  x @ w.T : (M, N) f32."""
    M, K = x.shape
    N, _ = w.shape
    tm = _pick_tile(M, 256, 8)
    tn = _pick_tile(N, 256, 128)
    tk = _pick_tile(K, 512, 128)
    grid = (M // tm, N // tn, K // tk)
    return pl.pallas_call(
        _matmul_kernel,
        out_shape=jax.ShapeDtypeStruct((M, N), jnp.float32),
        grid_spec=pltpu.PrefetchScalarGridSpec(
            num_scalar_prefetch=0,
            grid=grid,
            in_specs=[
                pl.BlockSpec((tm, tk), lambda i, j, k: (i, k)),
                pl.BlockSpec((tn, tk), lambda i, j, k: (j, k)),
            ],
            out_specs=pl.BlockSpec((tm, tn), lambda i, j, k: (i, j)),
        ),
        compiler_params=pltpu.CompilerParams(
            dimension_semantics=("parallel", "parallel", "arbitrary"),
            vmem_limit_bytes=_VMEM_LIMIT),
    )(x, w)


# ----------------------------------------------------------------------------
# Kernel 2a: activation fake-quant codes  xq = clip(round(x * colmul))  (bf16)
#   colmul = (1 / migration_scale) / a_scale   (per input channel, folded)
# ----------------------------------------------------------------------------
def _quant_x_kernel(x_ref, colmul_ref, o_ref, *, qmin, qmax):
    codes = jnp.clip(jnp.round(x_ref[...] * colmul_ref[...]), qmin, qmax)
    o_ref[...] = codes.astype(o_ref.dtype)


def quant_codes_x(x, colmul, qmin, qmax):
    M, K = x.shape
    tm = _pick_tile(M, 256, 8)
    tk = _pick_tile(K, 512, 128)
    kernel = functools.partial(_quant_x_kernel, qmin=qmin, qmax=qmax)
    return pl.pallas_call(
        kernel,
        out_shape=jax.ShapeDtypeStruct((M, K), jnp.bfloat16),
        grid_spec=pltpu.PrefetchScalarGridSpec(
            num_scalar_prefetch=0,
            grid=(M // tm, K // tk),
            in_specs=[
                pl.BlockSpec((tm, tk), lambda i, k: (i, k)),
                pl.BlockSpec((1, tk), lambda i, k: (0, k)),
            ],
            out_specs=pl.BlockSpec((tm, tk), lambda i, k: (i, k)),
        ),
        compiler_params=pltpu.CompilerParams(
            dimension_semantics=("parallel", "parallel"),
            vmem_limit_bytes=_VMEM_LIMIT),
    )(x, colmul.reshape(1, K))


# ----------------------------------------------------------------------------
# Kernel 2b: weight fake-quant codes  wq = clip(round(w * colmul * rowmul))
#   colmul = migration_scale (per input channel), rowmul = 1 / w_scale (per row)
# ----------------------------------------------------------------------------
def _quant_w_kernel(w_ref, colmul_ref, rowmul_ref, o_ref, *, qmin, qmax):
    scaled = w_ref[...] * colmul_ref[...] * rowmul_ref[...]
    o_ref[...] = jnp.clip(jnp.round(scaled), qmin, qmax).astype(o_ref.dtype)


def quant_codes_w(w, colmul, rowmul, qmin, qmax):
    N, K = w.shape
    tn = _pick_tile(N, 256, 8)
    tk = _pick_tile(K, 512, 128)
    kernel = functools.partial(_quant_w_kernel, qmin=qmin, qmax=qmax)
    return pl.pallas_call(
        kernel,
        out_shape=jax.ShapeDtypeStruct((N, K), jnp.bfloat16),
        grid_spec=pltpu.PrefetchScalarGridSpec(
            num_scalar_prefetch=0,
            grid=(N // tn, K // tk),
            in_specs=[
                pl.BlockSpec((tn, tk), lambda j, k: (j, k)),
                pl.BlockSpec((1, tk), lambda j, k: (0, k)),
                pl.BlockSpec((tn, 1), lambda j, k: (j, 0)),
            ],
            out_specs=pl.BlockSpec((tn, tk), lambda j, k: (j, k)),
        ),
        compiler_params=pltpu.CompilerParams(
            dimension_semantics=("parallel", "parallel"),
            vmem_limit_bytes=_VMEM_LIMIT),
    )(w, colmul.reshape(1, K), rowmul.reshape(N, 1))


# ----------------------------------------------------------------------------
# Kernel 3: bf16-code matmul + squared-error partial sums vs. fp32 reference.
#   qout = (xq @ wq.T) * (a_scale * w_scale[col])
#   partials[i, j] = (8,128) lane-wise partial sums of (qout - ref)^2
# ----------------------------------------------------------------------------
def _fq_loss_kernel(xq_ref, wq_ref, oscale_ref, ref_ref, part_ref, acc_ref):
    k = pl.program_id(2)

    @pl.when(k == 0)
    def _():
        acc_ref[...] = jnp.zeros_like(acc_ref)

    # bf16 integer codes (exact) into the MXU, f32 accumulation, no transpose.
    acc_ref[...] += lax.dot_general(
        xq_ref[...], wq_ref[...],
        dimension_numbers=(((1,), (1,)), ((), ())),
        preferred_element_type=jnp.float32)

    @pl.when(k == pl.num_programs(2) - 1)
    def _():
        tm, tn = acc_ref.shape
        oscale = oscale_ref[...]                      # (1, tn)
        psum = jnp.zeros((8, 128), jnp.float32)
        # vreg-aligned chunks: VPU-only epilogue, no cross-lane reduce.
        for si in range(tm // 8):
            sl = slice(si * 8, (si + 1) * 8)
            qout = acc_ref[sl, :] * oscale            # back to real domain
            d = qout - ref_ref[sl, :]
            d2 = d * d
            for li in range(tn // 128):
                psum = psum + d2[:, li * 128:(li + 1) * 128]
        part_ref[...] = psum[None, None]


def fq_loss_partials(xq, wq, out_scale, ref):
    M, K = xq.shape
    N, _ = wq.shape
    tm = _pick_tile(M, 256, 8)
    tn = _pick_tile(N, 256, 128)
    tk = _pick_tile(K, 512, 128)
    assert tm % 8 == 0 and tn % 128 == 0, "need M % 8 == 0 and N % 128 == 0"
    gi, gj, gk = M // tm, N // tn, K // tk
    return pl.pallas_call(
        _fq_loss_kernel,
        out_shape=jax.ShapeDtypeStruct((gi, gj, 8, 128), jnp.float32),
        grid_spec=pltpu.PrefetchScalarGridSpec(
            num_scalar_prefetch=0,
            grid=(gi, gj, gk),
            in_specs=[
                pl.BlockSpec((tm, tk), lambda i, j, k: (i, k)),   # xq codes
                pl.BlockSpec((tn, tk), lambda i, j, k: (j, k)),   # wq codes
                pl.BlockSpec((1, tn), lambda i, j, k: (0, j)),    # a_scale*w_scale
                pl.BlockSpec((tm, tn), lambda i, j, k: (i, j)),   # fp32 reference
            ],
            out_specs=pl.BlockSpec((1, 1, 8, 128), lambda i, j, k: (i, j, 0, 0)),
            scratch_shapes=[pltpu.VMEM((tm, tn), jnp.float32)],
        ),
        compiler_params=pltpu.CompilerParams(
            dimension_semantics=("parallel", "parallel", "arbitrary"),
            vmem_limit_bytes=_VMEM_LIMIT),
    )(xq, wq, out_scale.reshape(1, N), ref)


# ----------------------------------------------------------------------------
# Device-side 20-candidate ratio search (single jit, no per-candidate sync)
# ----------------------------------------------------------------------------
@functools.partial(jax.jit, static_argnames=("a_bit", "w_bit", "n_grid"))
def _search_migrate_range(x2d, weight, ref_out, x_max, colmax, colmin, *,
                          a_bit, w_bit, n_grid):
    M, K = x2d.shape
    a_qmin, a_qmax = float(-(2 ** (a_bit - 1))), float(2 ** (a_bit - 1) - 1)
    w_qmin, w_qmax = float(-(2 ** (w_bit - 1))), float(2 ** (w_bit - 1) - 1)

    ratios = jnp.arange(n_grid, dtype=jnp.float32) / n_grid
    scales_all = jnp.maximum(jnp.power(x_max[None, :], ratios[:, None]), 1e-4)
    norm = jnp.sqrt(jnp.max(scales_all, axis=1) * jnp.min(scales_all, axis=1))
    scales_all = scales_all / norm[:, None]                        # (n_grid, K)

    def one_candidate(scales):
        inv_s = 1.0 / scales
        # per-tensor symmetric activation scale from precomputed column stats
        amax = jnp.maximum(jnp.max(colmax * inv_s), 0.0)
        amin = jnp.minimum(jnp.min(colmin * inv_s), 0.0)
        a_scale = jnp.maximum(
            jnp.maximum(-amin, amax) / ((a_qmax - a_qmin) / 2.0), 1e-8)
        # per-output-channel symmetric weight scale (fused reduce; w*scales is
        # never materialized in HBM)
        w_absmax = jnp.max(jnp.abs(weight) * scales[None, :], axis=1)
        w_scale = jnp.maximum(w_absmax / ((w_qmax - w_qmin) / 2.0), 1e-8)

        xq = quant_codes_x(x2d, inv_s / a_scale, a_qmin, a_qmax)
        wq = quant_codes_w(weight, scales, 1.0 / w_scale, w_qmin, w_qmax)
        partials = fq_loss_partials(xq, wq, a_scale * w_scale, ref_out)
        # loss_fx: (pred - tgt)^2 .sum(-1).mean()  ==  total_sq_err / M
        return jnp.sum(partials) / M

    losses = lax.map(one_candidate, scales_all)
    best = jnp.argmin(losses)
    return scales_all[best], losses[best], best


# ----------------------------------------------------------------------------
# The migrator (module_type = "down_proj" / "o_proj" semantics)
# ----------------------------------------------------------------------------
class Migrator1DRangeSearchAWQ:
    def __init__(self, x, weight, a_bit=8, w_bit=4, observation_mask=None):
        # x:      (B, N, C_in)  float32
        # weight: (C_out, C_in) float32
        self.x = x.astype(jnp.float32)
        self.weight = weight.astype(jnp.float32)
        self.a_bit = a_bit
        self.w_bit = w_bit
        B, N, C = x.shape
        self.M = B * N
        self.C = C

        # TODO(synk): data-dependent boolean row selection (observation_mask)
        # has no static-shape Pallas equivalent; all-ones mask is assumed.
        self.x2d = self.x.reshape(self.M, C)

        # fp32 reference output (down_proj / o_proj: out = x @ W^T)
        self.output = matmul_xwt(self.x2d, self.weight)

        # AWQ activation statistic + per-channel min/max for the observer
        self.x_max = jnp.mean(jnp.abs(self.x2d), axis=0)
        self.colmax = jnp.max(self.x2d, axis=0)
        self.colmin = jnp.min(self.x2d, axis=0)

        self.amx = float(jnp.maximum(jnp.max(self.x2d), 0.0))
        self.num = max(100, int(self.amx / 0.5))  # kept for parity with spec

    def search_migrate_range_1D(self, n_grid=20):
        best_scales, best_loss, _ = _search_migrate_range(
            self.x2d, self.weight, self.output,
            self.x_max, self.colmax, self.colmin,
            a_bit=self.a_bit, w_bit=self.w_bit, n_grid=n_grid)
        if not bool(jnp.isfinite(best_loss)):
            raise Exception("no valid ratio found")
        return best_scales.reshape(-1)

    def forward(self):
        best_scales = self.search_migrate_range_1D()
        return best_scales  # get_best_scale() only logs and returns scales


# ----------------------------------------------------------------------------
if __name__ == "__main__":
    key = jax.random.PRNGKey(0)
    kx, kw = jax.random.split(key)

    B, N_SEQ, C_IN, C_OUT = 2, 64, 256, 256
    x = jax.random.normal(kx, (B, N_SEQ, C_IN), dtype=jnp.float32) * 2.0
    weight = jax.random.normal(kw, (C_OUT, C_IN), dtype=jnp.float32) * 0.05

    migrator = Migrator1DRangeSearchAWQ(x, weight, a_bit=8, w_bit=4)
    best_scales = migrator.forward()
    best_scales = jax.block_until_ready(best_scales)

    assert best_scales.shape == (C_IN,)
    assert bool(jnp.all(jnp.isfinite(best_scales)))
    assert bool(jnp.all(best_scales > 0.0))
    print("KERNEL_OK")
</pallas_src>

<mosaic_0001>
module attributes {stable_mosaic.version = 11 : i64} {
  func.func @_matmul_kernel(%arg0: i32, %arg1: i32, %arg2: i32, %arg3: memref<128x256xf32, #tpu.memory_space<vmem>>, %arg4: memref<256x256xf32, #tpu.memory_space<vmem>>, %arg5: memref<128x256xf32, #tpu.memory_space<vmem>>) attributes {dimension_semantics = [#tpu.dimension_semantics<parallel>, #tpu.dimension_semantics<parallel>, #tpu.dimension_semantics<arbitrary>], iteration_bounds = array<i64: 1, 1, 1>, scalar_prefetch = 0 : i64, scratch_operands = 0 : i64, tpu.core_type = #tpu.core_type<tc>, window_params = [{transform_indices = @transform_0, window_bounds = array<i64: 128, 256>}, {transform_indices = @transform_1, window_bounds = array<i64: 256, 256>}, {transform_indices = @transform_2, window_bounds = array<i64: 128, 256>}]} {
    %c0_i32 = arith.constant 0 : i32
    %0 = arith.cmpi eq, %arg2, %c0_i32 : i32
    %1 = arith.extui %0 : i1 to i32
    %c0_i32_0 = arith.constant 0 : i32
    %2 = arith.cmpi ne, %1, %c0_i32_0 : i32
    scf.if %2 {
      %cst_8 = arith.constant 0.000000e+00 : f32
      %9 = vector.broadcast %cst_8 : f32 to vector<128x256xf32>
      %c0_9 = arith.constant 0 : index
      %c0_10 = arith.constant 0 : index
      %10 = vector.load %arg5[%c0_9, %c0_10] : memref<128x256xf32, #tpu.memory_space<vmem>>, vector<128x256xf32>
      tpu.vector_store %arg5[%c0_9, %c0_10], %9 {strides = array<i32>} : memref<128x256xf32, #tpu.memory_space<vmem>>, vector<128x256xf32>,
    } else {
    }
    %c0 = arith.constant 0 : index
    %c0_1 = arith.constant 0 : index
    %3 = vector.load %arg5[%c0, %c0_1] : memref<128x256xf32, #tpu.memory_space<vmem>>, vector<128x256xf32>
    %c0_2 = arith.constant 0 : index
    %c0_3 = arith.constant 0 : index
    %4 = vector.load %arg3[%c0_2, %c0_3] : memref<128x256xf32, #tpu.memory_space<vmem>>, vector<128x256xf32>
    %c0_4 = arith.constant 0 : index
    %c0_5 = arith.constant 0 : index
    %5 = vector.load %arg4[%c0_4, %c0_5] : memref<256x256xf32, #tpu.memory_space<vmem>>, vector<256x256xf32>
    %cst = arith.constant dense<0.000000e+00> : vector<128x256xf32>
    %6 = tpu.matmul %4, %5, %cst {dimension_numbers = #tpu.dot_dimension_numbers<[1], [1], [0], [0], [0, 0, 1, 0], [], []>} : vector<128x256xf32>, vector<256x256xf32>, vector<128x256xf32> -> vector<128x256xf32>
    %7 = arith.addf %3, %6 : vector<128x256xf32>
    %c0_6 = arith.constant 0 : index
    %c0_7 = arith.constant 0 : index
    %8 = vector.load %arg5[%c0_6, %c0_7] : memref<128x256xf32, #tpu.memory_space<vmem>>, vector<128x256xf32>
    tpu.vector_store %arg5[%c0_6, %c0_7], %7 {strides = array<i32>} : memref<128x256xf32, #tpu.memory_space<vmem>>, vector<128x256xf32>,
    return
  }
  func.func @transform_0(%arg0: i32, %arg1: i32, %arg2: i32) -> (i32, i32) {
    %c0_i32 = arith.constant 0 : i32
    return %arg0, %arg2 : i32, i32
  }
  func.func @transform_1(%arg0: i32, %arg1: i32, %arg2: i32) -> (i32, i32) {
    %c0_i32 = arith.constant 0 : i32
    return %arg1, %arg2 : i32, i32
  }
  func.func @transform_2(%arg0: i32, %arg1: i32, %arg2: i32) -> (i32, i32) {
    %c0_i32 = arith.constant 0 : i32
    return %arg0, %arg1 : i32, i32
  }
}

</mosaic_0001>

<bundles_post_ra>
// kernel: tpu_custom_call.1
= control target key start
LH: loop header
LB: loop body
LE: loop exit
PB: predicated region body
PF: predicated region fallthrough
CT: control target
= control target key end

     0   :  { %7 = vsyncpa [#allocation3], 0  ;;  %s686_s0 = inlined_call_operand.hbm [shape: f32[128,256], index: 0, kind: input, shape index: {}]   ;;  %s687_s1 = inlined_call_operand.hbm [shape: f32[256,256], index: 1, kind: input, shape index: {}]   ;;  %s688_s2 = inlined_call_operand.hbm [shape: f32[128,256], index: 2, kind: output, shape index: {}]  }
   0x1   :  { %8 = vsyncpa [#allocation6], 0 }
   0x2   :  { %9 = vsyncpa [#allocation4], 0  ;;  %s621_s9 = smov [#allocation2]   ;;  %s549_s13 = scalar_lea.hbm %s686_s0, 4096 }
   0x3   :  { %s15_s10 = sshll.u32 %s621_s9, 4  ;;  %p550_p0 = scmp.ne.s32.totalorder %s686_s0, %s549_s13  ;;  %s16_s10 = int_to_ptr.vmem [resolvable:$true] %s15_s10 }
   0x4   :  { %p553_p1 = scmp.lt.u32.totalorder %s549_s13, %s686_s0 }
   0x6   :  { %p555_p2 = pnand %p553_p1, %p550_p0 }
   0x8   :  { %558 = shalt.err (!%p555_p2)
}
   0x9   :  { %s559_s18 = scalar_lea.vmem %s16_s10, 4096  ;;  %p564_p4 = scmp.lt.s32.totalorder %s16_s10, %s16_s10 }
   0xa   :  { %p560_p3 = scmp.ne.s32.totalorder %s16_s10, %s559_s18  ;;  %p565_p5 = scmp.lt.s32.totalorder %s559_s18, %s559_s18 }
   0xc   :  { %p566_p6 = por %p565_p5, %p564_p4 }
   0xe   :  { %p567_p7 = pnand %p566_p6, %p560_p3 }
  0x10   :  { %570 = shalt.err (!%p567_p7)
}
  0x11   :  { %s622_s19 = smov 256   ;;  %s623_s20 = smov 16  }
  0x12   :  { %21 = dma.hbm_to_vmem [thread:$0]  %s686_s0, 4096, %s16_s10, [#allocation3], %s622_s19, %s622_s19, %s623_s20  }
  0x13   :  { %s624_s23 = smov [#allocation5]   ;;  %s571_s27 = scalar_lea.hbm %s687_s1, 8192 }
  0x14   :  { %s27_s24 = sshll.u32 %s624_s23, 4  ;;  %p572_p8 = scmp.ne.s32.totalorder %s687_s1, %s571_s27  ;;  %s28_s24 = int_to_ptr.vmem [resolvable:$true] %s27_s24 }
  0x15   :  { %p575_p9 = scmp.lt.u32.totalorder %s571_s27, %s687_s1 }
  0x17   :  { %p577_p10 = pnand %p575_p9, %p572_p8 }
  0x19   :  { %580 = shalt.err (!%p577_p10)
}
  0x1a   :  { %s581_s4 = scalar_lea.vmem %s28_s24, 8192  ;;  %p586_p12 = scmp.lt.s32.totalorder %s28_s24, %s28_s24 }
  0x1b   :  { %p582_p11 = scmp.ne.s32.totalorder %s28_s24, %s581_s4  ;;  %p587_p13 = scmp.lt.s32.totalorder %s581_s4, %s581_s4 }
  0x1d   :  { %p588_p0 = por %p587_p13, %p586_p12 }
  0x1f   :  { %p589_p1 = pnand %p588_p0, %p582_p11 }
  0x21   :  { %592 = shalt.err (!%p589_p1)
}
  0x22   :  { %33 = dma.hbm_to_vmem [thread:$0]  %s687_s1, 8192, %s28_s24, [#allocation6], %s622_s19, %s622_s19, %s623_s20  }
  0x23   :  { %615 = dma.done.wait [#allocation3], 4096  }
  0x24   :  { %616 = vsyncadd [#allocation3], 4294963200 }
  0x25   :  { %617 = dma.done.wait [#allocation6], 8192  }
  0x26   :  { %618 = vsyncadd [#allocation6], 4294959104  ;;  %v141_v0 = vld [vmem:[#allocation5 + $0x8] sm:$0xff]  ;;  %v143_v1 = vld [vmem:[#allocation5 + $0x18] sm:$0xff]  ;;  %s625_s1 = smov [#allocation7]  }
  0x27   :  { %v140_v2 = vld [vmem:[#allocation5] sm:$0xff]  ;;  %v447_v3 = vpack.c.bf16 %v143_v1, %v141_v0  ;;  %v142_v4 = vld [vmem:[#allocation5 + $0x10] sm:$0xff]  ;;  %v145_v5 = vld [vmem:[#allocation5 + $0x28] sm:$0xff]  ;;  %s434_s6 = sshll.u32 %s625_s1, 4  ;;  %s435_s6 = int_to_ptr.vmem [resolvable:$true] %s434_s6 }
  0x28   :  { %v147_v6 = vld [vmem:[#allocation5 + $0x38] sm:$0xff]  ;;  %v449_v7 = vpack.c.bf16 %v142_v4, %v140_v2  ;;  %v144_v9 = vld [vmem:[#allocation5 + $0x20] sm:$0xff]  ;;  %v146_v10 = vld [vmem:[#allocation5 + $0x30] sm:$0xff]  ;;  %s593_s7 = scalar_lea.vmem %s435_s6, 4096  ;;  %p598_p3 = scmp.lt.s32.totalorder %s435_s6, %s435_s6 }
  0x29   :  { %v451_v8 = vpack.c.bf16 %v147_v6, %v145_v5  ;;  %448 = vmatprep.subr.bf16.mxu0 %v447_v3  ;;  %511 = vmatprep.subr.bf16.mxu1 %v447_v3  ;;  %v149_v11 = vld [vmem:[#allocation5 + $0x48] sm:$0xff]  ;;  %v151_v12 = vld [vmem:[#allocation5 + $0x58] sm:$0xff]  ;;  %v453_v13 = vpack.c.bf16 %v146_v10, %v144_v9  ;;  %v148_v15 = vld [vmem:[#allocation5 + $0x40] sm:$0xff]  ;;  %p594_p2 = scmp.ne.s32.totalorder %s435_s6, %s593_s7  ;;  %p599_p4 = scmp.lt.s32.totalorder %s593_s7, %s593_s7 }
  0x2a   :  { %450 = vmatpush1.bf16.xpose.msra.mxu0 %v449_v7  ;;  %527 = vmatpush1.bf16.xpose.msra.mxu1 %v449_v7  ;;  %v455_v14 = vpack.c.bf16 %v151_v12, %v149_v11  ;;  %v150_v16 = vld [vmem:[#allocation5 + $0x50] sm:$0xff]  ;;  %v153_v17 = vld [vmem:[#allocation5 + $0x68] sm:$0xff]  ;;  %v155_v18 = vld [vmem:[#allocation5 + $0x78] sm:$0xff] }
  0x2b   :  { %452 = vmatprep.subr.bf16.mxu0 %v451_v8  ;;  %512 = vmatprep.subr.bf16.mxu1 %v451_v8  ;;  %v457_v19 = vpack.c.bf16 %v150_v16, %v148_v15  ;;  %v459_v20 = vpack.c.bf16 %v155_v18, %v153_v17  ;;  %v152_v21 = vld [vmem:[#allocation5 + $0x60] sm:$0xff]  ;;  %v154_v22 = vld [vmem:[#allocation5 + $0x70] sm:$0xff]  ;;  %v109_v23 = vld [vmem:[#allocation2 + $0x8] sm:$0xff]  ;;  %p600_p5 = por %p599_p4, %p598_p3 }
  0x2c   :  { %v125_v24 = vld [vmem:[#allocation2 + $0x88] sm:$0xff]  ;;  %v159_v26 = vld [vmem:[#allocation5 + $0x98] sm:$0xff]  ;;  %268 = vmatprep.mubr.f32.mxu0 %v109_v23  ;;  %v461_v27 = vpack.c.bf16 %v154_v22, %v152_v21  ;;  %v156_v29 = vld [vmem:[#allocation5 + $0x80] sm:$0xff] }
  0x2d   :  { %v157_v25 = vld [vmem:[#allocation5 + $0x88] sm:$0xff]  ;;  %316 = vmatprep.mubr.f32.mxu1 %v125_v24  ;;  %v158_v30 = vld [vmem:[#allocation5 + $0x90] sm:$0xff]  ;;  %v163_v32 = vld [vmem:[#allocation5 + $0xb8] sm:$0xff]  ;;  %p601_p6 = pnand %p600_p5, %p594_p2 }
  0x2e   :  { %v463_v28 = vpack.c.bf16 %v159_v26, %v157_v25  ;;  %v161_v31 = vld [vmem:[#allocation5 + $0xa8] sm:$0xff]  ;;  %v465_v33 = vpack.c.bf16 %v158_v30, %v156_v29  ;;  %v160_v35 = vld [vmem:[#allocation5 + $0xa0] sm:$0xff]  ;;  %v162_v36 = vld [vmem:[#allocation5 + $0xb0] sm:$0xff] }
  0x2f   :  { %v467_v34 = vpack.c.bf16 %v163_v32, %v161_v31  ;;  %v165_v37 = vld [vmem:[#allocation5 + $0xc8] sm:$0xff]  ;;  %v167_v38 = vld [vmem:[#allocation5 + $0xd8] sm:$0xff]  ;;  %v469_v39 = vpack.c.bf16 %v162_v36, %v160_v35  ;;  %v164_v41 = vld [vmem:[#allocation5 + $0xc0] sm:$0xff] }
  0x30   :  { %v471_v40 = vpack.c.bf16 %v167_v38, %v165_v37  ;;  %v166_v42 = vld [vmem:[#allocation5 + $0xd0] sm:$0xff]  ;;  %v169_v43 = vld [vmem:[#allocation5 + $0xe8] sm:$0xff]  ;;  %v171_v44 = vld [vmem:[#allocation5 + $0xf8] sm:$0xff] }
  0x31   :  { %v473_v45 = vpack.c.bf16 %v166_v42, %v164_v41  ;;  %v475_v46 = vpack.c.bf16 %v171_v44, %v169_v43  ;;  %v168_v47 = vld [vmem:[#allocation5 + $0xe0] sm:$0xff]  ;;  %v170_v48 = vld [vmem:[#allocation5 + $0xf0] sm:$0xff]  ;;  %v173_v49 = vld [vmem:[#allocation5 + $0x108] sm:$0xff] }
  0x32   :  { %454 = vmatpush1.bf16.xpose.msra.mxu0 %v453_v13  ;;  %528 = vmatpush1.bf16.xpose.msra.mxu1 %v453_v13  ;;  %v175_v50 = vld [vmem:[#allocation5 + $0x118] sm:$0xff]  ;;  %v477_v51 = vpack.c.bf16 %v170_v48, %v168_v47  ;;  %v172_v53 = vld [vmem:[#allocation5 + $0x100] sm:$0xff]  ;;  %v174_v54 = vld [vmem:[#allocation5 + $0x110] sm:$0xff] }
  0x33   :  { %456 = vmatprep.subr.bf16.mxu0 %v455_v14  ;;  %513 = vmatprep.subr.bf16.mxu1 %v455_v14  ;;  %v479_v52 = vpack.c.bf16 %v175_v50, %v173_v49  ;;  %v177_v55 = vld [vmem:[#allocation5 + $0x128] sm:$0xff]  ;;  %v179_v56 = vld [vmem:[#allocation5 + $0x138] sm:$0xff]  ;;  %v481_v57 = vpack.c.bf16 %v174_v54, %v172_v53  ;;  %v176_v59 = vld [vmem:[#allocation5 + $0x120] sm:$0xff] }
  0x34   :  { %v483_v58 = vpack.c.bf16 %v179_v56, %v177_v55  ;;  %v178_v60 = vld [vmem:[#allocation5 + $0x130] sm:$0xff]  ;;  %v181_v61 = vld [vmem:[#allocation5 + $0x148] sm:$0xff]  ;;  %v183_v62 = vld [vmem:[#allocation5 + $0x158] sm:$0xff] }
  0x35   :  { %v485_v63 = vpack.c.bf16 %v178_v60, %v176_v59  ;;  %v487_v0 = vpack.c.bf16 %v183_v62, %v181_v61  ;;  %v180_v1 = vld [vmem:[#allocation5 + $0x140] sm:$0xff]  ;;  %v182_v2 = vld [vmem:[#allocation5 + $0x150] sm:$0xff]  ;;  %v185_v3 = vld [vmem:[#allocation5 + $0x168] sm:$0xff] }
  0x36   :  { %v187_v4 = vld [vmem:[#allocation5 + $0x178] sm:$0xff]  ;;  %v489_v5 = vpack.c.bf16 %v182_v2, %v180_v1  ;;  %v184_v7 = vld [vmem:[#allocation5 + $0x160] sm:$0xff]  ;;  %v186_v8 = vld [vmem:[#allocation5 + $0x170] sm:$0xff] }
  0x37   :  { %v491_v6 = vpack.c.bf16 %v187_v4, %v185_v3  ;;  %v189_v9 = vld [vmem:[#allocation5 + $0x188] sm:$0xff]  ;;  %v191_v10 = vld [vmem:[#allocation5 + $0x198] sm:$0xff]  ;;  %v493_v11 = vpack.c.bf16 %v186_v8, %v184_v7  ;;  %v188_v13 = vld [vmem:[#allocation5 + $0x180] sm:$0xff] }
  0x38   :  { %v495_v12 = vpack.c.bf16 %v191_v10, %v189_v9  ;;  %v190_v14 = vld [vmem:[#allocation5 + $0x190] sm:$0xff]  ;;  %v193_v15 = vld [vmem:[#allocation5 + $0x1a8] sm:$0xff]  ;;  %v195_v16 = vld [vmem:[#allocation5 + $0x1b8] sm:$0xff] }
  0x39   :  { %v497_v17 = vpack.c.bf16 %v190_v14, %v188_v13  ;;  %v499_v18 = vpack.c.bf16 %v195_v16, %v193_v15  ;;  %v197_v21 = vld [vmem:[#allocation5 + $0x1c8] sm:$0xff]  ;;  %v199_v22 = vld [vmem:[#allocation5 + $0x1d8] sm:$0xff]  ;;  %v196_v25 = vld [vmem:[#allocation5 + $0x1c0] sm:$0xff] }
  0x3a   :  { %458 = vmatpush1.bf16.xpose.msra.mxu0 %v457_v19  ;;  %529 = vmatpush1.bf16.xpose.msra.mxu1 %v457_v19  ;;  %v192_v19 = vld [vmem:[#allocation5 + $0x1a0] sm:$0xff]  ;;  %v503_v24 = vpack.c.bf16 %v199_v22, %v197_v21  ;;  %v198_v26 = vld [vmem:[#allocation5 + $0x1d0] sm:$0xff]  ;;  %v111_v36 = vld [vmem:[#allocation2 + $0x18] sm:$0xff] }
  0x3b   :  { %460 = vmatprep.subr.bf16.mxu0 %v459_v20  ;;  %514 = vmatprep.subr.bf16.mxu1 %v459_v20  ;;  %v194_v20 = vld [vmem:[#allocation5 + $0x1b0] sm:$0xff]  ;;  %v505_v29 = vpack.c.bf16 %v198_v26, %v196_v25  ;;  %v200_v31 = vld [vmem:[#allocation5 + $0x1e0] sm:$0xff]  ;;  %v127_v37 = vld [vmem:[#allocation2 + $0x98] sm:$0xff] }
  0x3c   :  { %v501_v23 = vpack.c.bf16 %v194_v20, %v192_v19  ;;  %v202_v32 = vld [vmem:[#allocation5 + $0x1f0] sm:$0xff]  ;;  %v124_v35 = vld [vmem:[#allocation2 + $0x80] sm:$0xff]  ;;  %v129_v41 = vld [vmem:[#allocation2 + $0xa8] sm:$0xff] }
  0x3d   :  { %v110_v38 = vld [vmem:[#allocation2 + $0x10] sm:$0xff]  ;;  %v112_v42 = vld [vmem:[#allocation2 + $0x20] sm:$0xff]  ;;  %v115_v44 = vld [vmem:[#allocation2 + $0x38] sm:$0xff] }
  0x3e   :  { %v128_v43 = vld [vmem:[#allocation2 + $0xa0] sm:$0xff]  ;;  %v130_v47 = vld [vmem:[#allocation2 + $0xb0] sm:$0xff]  ;;  %v117_v48 = vld [vmem:[#allocation2 + $0x48] sm:$0xff] }
  0x3f   :  { %v133_v49 = vld [vmem:[#allocation2 + $0xc8] sm:$0xff]  ;;  %v116_v50 = vld [vmem:[#allocation2 + $0x40] sm:$0xff]  ;;  %v135_v53 = vld [vmem:[#allocation2 + $0xd8] sm:$0xff] }
  0x40   :  { %v118_v54 = vld [vmem:[#allocation2 + $0x50] sm:$0xff]  ;;  %v121_v56 = vld [vmem:[#allocation2 + $0x68] sm:$0xff]  ;;  %v136_v59 = vld [vmem:[#allocation2 + $0xe0] sm:$0xff] }
  0x41   :  { %v134_v55 = vld [vmem:[#allocation2 + $0xd0] sm:$0xff]  ;;  %v123_v60 = vld [vmem:[#allocation2 + $0x78] sm:$0xff] }
  0x42   :  { %462 = vmatpush1.bf16.xpose.msra.mxu0 %v461_v27  ;;  %530 = vmatpush1.bf16.xpose.msra.mxu1 %v461_v27  ;;  %v201_v27 = vld [vmem:[#allocation5 + $0x1e8] sm:$0xff]  ;;  %v139_v61 = vld [vmem:[#allocation2 + $0xf8] sm:$0xff]  ;;  %v122_v62 = vld [vmem:[#allocation2 + $0x70] sm:$0xff] }
  0x43   :  { %464 = vmatprep.subr.bf16.mxu0 %v463_v28  ;;  %515 = vmatprep.subr.bf16.mxu1 %v463_v28  ;;  %v203_v28 = vld [vmem:[#allocation5 + $0x1f8] sm:$0xff] }
  0x44   :  { %v507_v30 = vpack.c.bf16 %v203_v28, %v201_v27 }
  0x4a   :  { %466 = vmatpush1.bf16.xpose.msra.mxu0 %v465_v33  ;;  %531 = vmatpush1.bf16.xpose.msra.mxu1 %v465_v33  ;;  %v509_v33 = vpack.c.bf16 %v202_v32, %v200_v31 }
  0x4b   :  { %468 = vmatprep.subr.bf16.mxu0 %v467_v34  ;;  %516 = vmatprep.subr.bf16.mxu1 %v467_v34  ;;  %v108_v34 = vld [vmem:[#allocation2] sm:$0xff] }
  0x52   :  { %470 = vmatpush1.bf16.xpose.msra.mxu0 %v469_v39  ;;  %532 = vmatpush1.bf16.xpose.msra.mxu1 %v469_v39  ;;  %v126_v39 = vld [vmem:[#allocation2 + $0x90] sm:$0xff] }
  0x53   :  { %472 = vmatprep.subr.bf16.mxu0 %v471_v40  ;;  %517 = vmatprep.subr.bf16.mxu1 %v471_v40  ;;  %v113_v40 = vld [vmem:[#allocation2 + $0x28] sm:$0xff] }
  0x5a   :  { %474 = vmatpush1.bf16.xpose.msra.mxu0 %v473_v45  ;;  %533 = vmatpush1.bf16.xpose.msra.mxu1 %v473_v45  ;;  %v131_v45 = vld [vmem:[#allocation2 + $0xb8] sm:$0xff] }
  0x5b   :  { %476 = vmatprep.subr.bf16.mxu0 %v475_v46  ;;  %518 = vmatprep.subr.bf16.mxu1 %v475_v46  ;;  %v114_v46 = vld [vmem:[#allocation2 + $0x30] sm:$0xff] }
  0x62   :  { %478 = vmatpush1.bf16.xpose.msra.mxu0 %v477_v51  ;;  %534 = vmatpush1.bf16.xpose.msra.mxu1 %v477_v51  ;;  %v132_v51 = vld [vmem:[#allocation2 + $0xc0] sm:$0xff] }
  0x63   :  { %480 = vmatprep.subr.bf16.mxu0 %v479_v52  ;;  %519 = vmatprep.subr.bf16.mxu1 %v479_v52  ;;  %v119_v52 = vld [vmem:[#allocation2 + $0x58] sm:$0xff] }
  0x6a   :  { %482 = vmatpush1.bf16.xpose.msra.mxu0 %v481_v57  ;;  %535 = vmatpush1.bf16.xpose.msra.mxu1 %v481_v57  ;;  %v137_v57 = vld [vmem:[#allocation2 + $0xe8] sm:$0xff] }
  0x6b   :  { %484 = vmatprep.subr.bf16.mxu0 %v483_v58  ;;  %520 = vmatprep.subr.bf16.mxu1 %v483_v58  ;;  %v120_v58 = vld [vmem:[#allocation2 + $0x60] sm:$0xff] }
  0x72   :  { %486 = vmatpush1.bf16.xpose.msra.mxu0 %v485_v63  ;;  %536 = vmatpush1.bf16.xpose.msra.mxu1 %v485_v63  ;;  %v138_v63 = vld [vmem:[#allocation2 + $0xf0] sm:$0xff] }
  0x73   :  { %488 = vmatprep.subr.bf16.mxu0 %v487_v0  ;;  %521 = vmatprep.subr.bf16.mxu1 %v487_v0 }
  0x7a   :  { %490 = vmatpush1.bf16.xpose.msra.mxu0 %v489_v5  ;;  %537 = vmatpush1.bf16.xpose.msra.mxu1 %v489_v5 }
  0x7b   :  { %492 = vmatprep.subr.bf16.mxu0 %v491_v6  ;;  %522 = vmatprep.subr.bf16.mxu1 %v491_v6 }
  0x82   :  { %494 = vmatpush1.bf16.xpose.msra.mxu0 %v493_v11  ;;  %538 = vmatpush1.bf16.xpose.msra.mxu1 %v493_v11 }
  0x83   :  { %496 = vmatprep.subr.bf16.mxu0 %v495_v12  ;;  %523 = vmatprep.subr.bf16.mxu1 %v495_v12 }
  0x8a   :  { %498 = vmatpush1.bf16.xpose.msra.mxu0 %v497_v17  ;;  %539 = vmatpush1.bf16.xpose.msra.mxu1 %v497_v17 }
  0x8b   :  { %500 = vmatprep.subr.bf16.mxu0 %v499_v18  ;;  %524 = vmatprep.subr.bf16.mxu1 %v499_v18 }
  0x92   :  { %502 = vmatpush1.bf16.xpose.msra.mxu0 %v501_v23  ;;  %540 = vmatpush1.bf16.xpose.msra.mxu1 %v501_v23 }
  0x93   :  { %504 = vmatprep.subr.bf16.mxu0 %v503_v24  ;;  %525 = vmatprep.subr.bf16.mxu1 %v503_v24 }
  0x9a   :  { %506 = vmatpush1.bf16.xpose.msra.mxu0 %v505_v29  ;;  %541 = vmatpush1.bf16.xpose.msra.mxu1 %v505_v29 }
  0x9b   :  { %508 = vmatprep.subr.bf16.mxu0 %v507_v30  ;;  %526 = vmatprep.subr.bf16.mxu1 %v507_v30 }
  0xa2   :  { %510 = vmatpush1.bf16.xpose.msra.mxu0 %v509_v33  ;;  %542 = vmatpush1.bf16.xpose.msra.mxu1 %v509_v33 }
  0xa9   :  { %269 = vmatmul.mubr.f32.vlgmr.msra.gmra.mrb[0].mxu0 %v108_v34  ;;  %317 = vmatmul.mubr.f32.vlgmr.msra.gmra.mrb[0].mxu1 %v124_v35 }
  0xaa   :  { %274 = vmatprep.mubr.f32.mxu0 %v111_v36  ;;  %322 = vmatprep.mubr.f32.mxu1 %v127_v37 }
  0xad   :  { %275 = vmatmul.mubr.f32.gmra.mrb[2].mxu0 %v110_v38  ;;  %323 = vmatmul.mubr.f32.gmra.mrb[2].mxu1 %v126_v39 }
  0xae   :  { %280 = vmatprep.mubr.f32.mxu0 %v113_v40  ;;  %328 = vmatprep.mubr.f32.mxu1 %v129_v41 }
  0xb1   :  { %281 = vmatmul.mubr.f32.gmra.mrb[4].mxu0 %v112_v42  ;;  %329 = vmatmul.mubr.f32.gmra.mrb[4].mxu1 %v128_v43 }
  0xb2   :  { %286 = vmatprep.mubr.f32.mxu0 %v115_v44  ;;  %334 = vmatprep.mubr.f32.mxu1 %v131_v45 }
  0xb5   :  { %287 = vmatmul.mubr.f32.gmra.mrb[6].mxu0 %v114_v46  ;;  %335 = vmatmul.mubr.f32.gmra.mrb[6].mxu1 %v130_v47 }
  0xb6   :  { %292 = vmatprep.mubr.f32.mxu0 %v117_v48  ;;  %340 = vmatprep.mubr.f32.mxu1 %v133_v49 }
  0xb9   :  { %293 = vmatmul.mubr.f32.gmra.mrb[8].mxu0 %v116_v50  ;;  %341 = vmatmul.mubr.f32.gmra.mrb[8].mxu1 %v132_v51 }
  0xba   :  { %298 = vmatprep.mubr.f32.mxu0 %v119_v52  ;;  %346 = vmatprep.mubr.f32.mxu1 %v135_v53 }
  0xbd   :  { %299 = vmatmul.mubr.f32.gmra.mrb[10].mxu0 %v118_v54  ;;  %347 = vmatmul.mubr.f32.gmra.mrb[10].mxu1 %v134_v55 }
  0xbe   :  { %304 = vmatprep.mubr.f32.mxu0 %v121_v56  ;;  %352 = vmatprep.mubr.f32.mxu1 %v137_v57 }
  0xc1   :  { %305 = vmatmul.mubr.f32.gmra.mrb[12].mxu0 %v120_v58  ;;  %353 = vmatmul.mubr.f32.gmra.mrb[12].mxu1 %v136_v59 }
  0xc2   :  { %310 = vmatprep.mubr.f32.mxu0 %v123_v60  ;;  %358 = vmatprep.mubr.f32.mxu1 %v139_v61 }
  0xc5   :  { %311 = vmatmul.mubr.f32.gmra.mrb[14].mxu0 %v122_v62  ;;  %359 = vmatmul.mubr.f32.gmra.mrb[14].mxu1 %v138_v63 }
 0x17c   :  { %v270_v0 = vpop.f32.mrb[0].mxu0  ;;  %v318_v1 = vpop.f32.mrb[0].mxu1 }
 0x17d   :  { %v272_v2 = vpop.f32.mrb[1].mxu0  ;;  %v320_v3 = vpop.f32.mrb[1].mxu1  ;;  %397 = vst [vmem:[#allocation7] sm:$0xff] %v270_v0  ;;  %413 = vst [vmem:[#allocation7 + $0x80] sm:$0xff] %v318_v1 }
 0x17e   :  { %398 = vst [vmem:[#allocation7 + $0x8] sm:$0xff] %v272_v2  ;;  %414 = vst [vmem:[#allocation7 + $0x88] sm:$0xff] %v320_v3 }
 0x180   :  { %v276_v4 = vpop.f32.mrb[2].mxu0  ;;  %v324_v5 = vpop.f32.mrb[2].mxu1 }
 0x181   :  { %v278_v6 = vpop.f32.mrb[3].mxu0  ;;  %v326_v7 = vpop.f32.mrb[3].mxu1  ;;  %399 = vst [vmem:[#allocation7 + $0x10] sm:$0xff] %v276_v4  ;;  %415 = vst [vmem:[#allocation7 + $0x90] sm:$0xff] %v324_v5 }
 0x182   :  { %400 = vst [vmem:[#allocation7 + $0x18] sm:$0xff] %v278_v6  ;;  %416 = vst [vmem:[#allocation7 + $0x98] sm:$0xff] %v326_v7 }
 0x184   :  { %v282_v8 = vpop.f32.mrb[4].mxu0  ;;  %v330_v9 = vpop.f32.mrb[4].mxu1 }
 0x185   :  { %v284_v10 = vpop.f32.mrb[5].mxu0  ;;  %v332_v11 = vpop.f32.mrb[5].mxu1  ;;  %401 = vst [vmem:[#allocation7 + $0x20] sm:$0xff] %v282_v8  ;;  %417 = vst [vmem:[#allocation7 + $0xa0] sm:$0xff] %v330_v9 }
 0x186   :  { %402 = vst [vmem:[#allocation7 + $0x28] sm:$0xff] %v284_v10  ;;  %418 = vst [vmem:[#allocation7 + $0xa8] sm:$0xff] %v332_v11 }
 0x188   :  { %v288_v12 = vpop.f32.mrb[6].mxu0  ;;  %v336_v13 = vpop.f32.mrb[6].mxu1 }
 0x189   :  { %v290_v14 = vpop.f32.mrb[7].mxu0  ;;  %v338_v15 = vpop.f32.mrb[7].mxu1  ;;  %403 = vst [vmem:[#allocation7 + $0x30] sm:$0xff] %v288_v12  ;;  %419 = vst [vmem:[#allocation7 + $0xb0] sm:$0xff] %v336_v13 }
 0x18a   :  { %404 = vst [vmem:[#allocation7 + $0x38] sm:$0xff] %v290_v14  ;;  %420 = vst [vmem:[#allocation7 + $0xb8] sm:$0xff] %v338_v15 }
 0x18c   :  { %v294_v16 = vpop.f32.mrb[8].mxu0  ;;  %v342_v17 = vpop.f32.mrb[8].mxu1 }
 0x18d   :  { %v296_v18 = vpop.f32.mrb[9].mxu0  ;;  %v344_v19 = vpop.f32.mrb[9].mxu1  ;;  %405 = vst [vmem:[#allocation7 + $0x40] sm:$0xff] %v294_v16  ;;  %421 = vst [vmem:[#allocation7 + $0xc0] sm:$0xff] %v342_v17 }
 0x18e   :  { %406 = vst [vmem:[#allocation7 + $0x48] sm:$0xff] %v296_v18  ;;  %422 = vst [vmem:[#allocation7 + $0xc8] sm:$0xff] %v344_v19 }
 0x190   :  { %v300_v20 = vpop.f32.mrb[10].mxu0  ;;  %v348_v21 = vpop.f32.mrb[10].mxu1 }
 0x191   :  { %v302_v22 = vpop.f32.mrb[11].mxu0  ;;  %v350_v23 = vpop.f32.mrb[11].mxu1  ;;  %407 = vst [vmem:[#allocation7 + $0x50] sm:$0xff] %v300_v20  ;;  %423 = vst [vmem:[#allocation7 + $0xd0] sm:$0xff] %v348_v21 }
 0x192   :  { %408 = vst [vmem:[#allocation7 + $0x58] sm:$0xff] %v302_v22  ;;  %424 = vst [vmem:[#allocation7 + $0xd8] sm:$0xff] %v350_v23 }
 0x194   :  { %v306_v24 = vpop.f32.mrb[12].mxu0  ;;  %v354_v25 = vpop.f32.mrb[12].mxu1 }
 0x195   :  { %v308_v26 = vpop.f32.mrb[13].mxu0  ;;  %v356_v27 = vpop.f32.mrb[13].mxu1  ;;  %409 = vst [vmem:[#allocation7 + $0x60] sm:$0xff] %v306_v24  ;;  %425 = vst [vmem:[#allocation7 + $0xe0] sm:$0xff] %v354_v25 }
 0x196   :  { %410 = vst [vmem:[#allocation7 + $0x68] sm:$0xff] %v308_v26  ;;  %426 = vst [vmem:[#allocation7 + $0xe8] sm:$0xff] %v356_v27 }
 0x198   :  { %v312_v28 = vpop.f32.mrb[14].mxu0  ;;  %v360_v29 = vpop.f32.mrb[14].mxu1 }
 0x199   :  { %v314_v30 = vpop.f32.mrb[15].mxu0  ;;  %v362_v31 = vpop.f32.mrb[15].mxu1  ;;  %411 = vst [vmem:[#allocation7 + $0x70] sm:$0xff] %v312_v28  ;;  %427 = vst [vmem:[#allocation7 + $0xf0] sm:$0xff] %v360_v29 }
 0x19a   :  { %412 = vst [vmem:[#allocation7 + $0x78] sm:$0xff] %v314_v30  ;;  %428 = vst [vmem:[#allocation7 + $0xf8] sm:$0xff] %v362_v31 }
 0x19b   :  { %604 = shalt.err (!%p601_p6)
}
 0x19c   :  { %s605_s10 = scalar_lea.hbm %s688_s2, 4096 }
 0x19d   :  { %p606_p7 = scmp.ne.s32.totalorder %s688_s2, %s605_s10  ;;  %p609_p8 = scmp.lt.u32.totalorder %s605_s10, %s688_s2 }
 0x19f   :  { %p611_p9 = pnand %p609_p8, %p606_p7 }
 0x1a1   :  { %614 = shalt.err (!%p611_p9)
}
 0x1a2   :  { %440 = dma.vmem_to_hbm [thread:$0]  %s435_s6, 4096, %s688_s2, [#allocation4], %s622_s19, %s622_s19, %s623_s20  }
 0x1a3   :  { %619 = dma.done.wait [#allocation4], 4096  }
 0x1a4   :  { %620 = vsyncadd [#allocation4], 4294963200 }
 0x1a5   :  { %444 = vsyncpa [#allocation3], 1 }
 0x1a6   :  { %445 = vsyncpa [#allocation6], 1 }
 0x1a7   :  { %446 = vsyncpa [#allocation4], 1 }

</bundles_post_ra>
